<compile_context>
chip_gen: v6e
topology: v6e:2x2x1
jax: 0.10.0
libtpu: 0.0.40
codegen_flags: <defaults>
</compile_context>

<pallas_src>
import jax
import jax.numpy as jnp
from jax import lax
from jax.experimental import pallas as pl
from jax.experimental.pallas import tpu as pltpu


def _round_up(x, m):
    return ((x + m - 1) // m) * m


def _choose_tile_n(N, max_tile_n):
    max_tile_n = max(128, _round_up(max_tile_n, 128))
    if N < 1024:
        # Single grid step; block extents equal the full array, so no (8,128) alignment
        # constraints apply and a small batch pays exactly one fixed per-step cost.
        return N
    # Large batches: the fewest / largest steps that fit comfortably in VMEM, but keep the
    # grid at >= 2 steps so v7x's two TensorCores both get work via the "parallel" axis.
    return min(max_tile_n, _round_up(pl.cdiv(N, 2), 128))


def prob_loss_kernel(logits_ref, lab_ref, loss_ref):
    # logits_ref: (tile_n, C) native dtype; lab_ref: (1, tile_n) i32; loss_ref: (1, tile_n) f32
    tile_n, c = logits_ref.shape

    # Cast on load; all math in f32 (v5e has no bf16 VPU/EUP datapath).
    x = logits_ref[...].astype(jnp.float32)                       # (tile_n, C)

    # Transpose the tile to (C, tile_n) on the idle MXU: xt = I_C @ x^T (exact — rows are
    # just copied through the f32 accumulator).  Class axis -> sublanes, batch axis -> lanes,
    # so every op below is lane-dense and the result is already in the output layout.
    eye = (lax.broadcasted_iota(jnp.int32, (c, c), 0) ==
           lax.broadcasted_iota(jnp.int32, (c, c), 1)).astype(jnp.float32)
    xt = lax.dot_general(eye, x,
                         dimension_numbers=(((1,), (1,)), ((), ())),
                         preferred_element_type=jnp.float32)      # (C, tile_n) == x.T

    # Numerically stable softmax pieces along the class (sublane) axis.
    m = jnp.max(xt, axis=0, keepdims=True)                        # (1, tile_n)
    e = jnp.exp(xt - m)                                           # (C, tile_n)
    s = jnp.sum(e, axis=0, keepdims=True)                         # (1, tile_n), >= 1

    # Pick exp at the label row; labels arrive lane-dense as (1, tile_n).
    row_ids = lax.broadcasted_iota(jnp.int32, (c, tile_n), 0)
    onehot = row_ids == lab_ref[...]                              # (C, tile_n)
    picked = jnp.sum(jnp.where(onehot, e, jnp.float32(0.0)),
                     axis=0, keepdims=True)                       # (1, tile_n)

    # One (1, tile_n) reciprocal; approx=False keeps exact parity with the reference.
    loss_ref[...] = -(picked * pl.reciprocal(s, approx=False))


def prob_loss_stable(outputs, labels, max_tile_n=4096):
    """outputs: [N, C] float (f32/bf16), labels: [N] int -> loss: [N] float32.

    loss[i] = -softmax(outputs)[i, labels[i]]
    (matches NLLLoss(reduction='none')(Softmax(dim=-1)(outputs), labels); eps unused.)
    """
    N, C = outputs.shape
    tile_n = _choose_tile_n(N, max_tile_n)
    num_tiles = pl.cdiv(N, tile_n)
    n_pad = num_tiles * tile_n                                    # output rows (>= N), never padded in HBM

    # Lane-dense labels row; cheap reshape only (no pad, no copy of the logits).
    lab_row = labels.astype(jnp.int32).reshape(1, N)

    bytes_accessed = N * C * outputs.dtype.itemsize + N * 4 + N * 4  # logits + labels + loss

    loss = pl.pallas_call(
        prob_loss_kernel,
        out_shape=jax.ShapeDtypeStruct((1, n_pad), jnp.float32),
        grid=(num_tiles,),
        in_specs=[
            # Logits: ragged last block (undefined tail rows; their results are discarded).
            pl.BlockSpec((tile_n, C), lambda i: (i, 0)),
            # Labels: lane-dense row, one contiguous burst per step.
            pl.BlockSpec((1, tile_n), lambda i: (0, i)),
        ],
        # Lane-dense loss row: unmasked stores, contiguous writeback DMA.
        out_specs=pl.BlockSpec((1, tile_n), lambda i: (0, i)),
        compiler_params=pltpu.CompilerParams(
            dimension_semantics=("parallel",),          # shard row tiles across TCs on v7x
            vmem_limit_bytes=32 * 1024 * 1024),          # headroom guard (v5e default is 16 MiB)
        cost_estimate=pl.CostEstimate(
            flops=6 * N * C + 2 * N * C * C,             # elementwise + MXU transpose
            transcendentals=N * C,
            bytes_accessed=bytes_accessed),
    )(outputs, lab_row)

    return loss.reshape(-1)[:N]


if __name__ == "__main__":
    key = jax.random.PRNGKey(0)
    k1, k2, k3, k4 = jax.random.split(key, 4)

    # Small shapes consistent with the module: batch=8, num_classes=32.
    N, C = 8, 32
    outputs = jax.random.normal(k1, (N, C), dtype=jnp.float32)
    labels = jax.random.randint(k2, (N,), 0, C, dtype=jnp.int32)

    loss = jax.block_until_ready(prob_loss_stable(outputs, labels))
    ref = -jax.nn.softmax(outputs, axis=-1)[jnp.arange(N), labels]
    assert loss.shape == (N,)
    assert jnp.allclose(loss, ref, atol=1e-5, rtol=1e-5), (loss, ref)

    # Exercise the multi-tile / ragged (no-pad) / bf16 path: grid of 2, partial last block.
    N2, C2 = 1040, 32
    outputs2 = jax.random.normal(k3, (N2, C2), dtype=jnp.bfloat16)
    labels2 = jax.random.randint(k4, (N2,), 0, C2, dtype=jnp.int32)
    loss2 = jax.block_until_ready(prob_loss_stable(outputs2, labels2))
    ref2 = -jax.nn.softmax(outputs2.astype(jnp.float32), axis=-1)[jnp.arange(N2), labels2]
    assert loss2.shape == (N2,)
    assert jnp.allclose(loss2, ref2, atol=1e-5, rtol=1e-5), (loss2, ref2)

    print("KERNEL_OK")
</pallas_src>

<mosaic_0001>
module attributes {stable_mosaic.version = 11 : i64} {
  func.func @prob_loss_kernel(%arg0: i32, %arg1: memref<8x32xf32, #tpu.memory_space<vmem>>, %arg2: memref<1x8xi32, #tpu.memory_space<vmem>>, %arg3: memref<1x8xf32, #tpu.memory_space<vmem>>) attributes {dimension_semantics = [#tpu.dimension_semantics<parallel>], iteration_bounds = array<i64: 1>, scalar_prefetch = 0 : i64, scratch_operands = 0 : i64, tpu.core_type = #tpu.core_type<tc>, window_params = [{transform_indices = @transform_0, window_bounds = array<i64: 8, 32>}, {transform_indices = @transform_1, window_bounds = array<i64: 1, 8>}, {transform_indices = @transform_2, window_bounds = array<i64: 1, 8>}]} {
    %c0 = arith.constant 0 : index
    %c0_0 = arith.constant 0 : index
    %0 = vector.load %arg1[%c0, %c0_0] : memref<8x32xf32, #tpu.memory_space<vmem>>, vector<8x32xf32>
    %1 = tpu.iota {dimensions = array<i32: 0>} : vector<32x32xi32>
    %2 = tpu.iota {dimensions = array<i32: 1>} : vector<32x32xi32>
    %3 = arith.cmpi eq, %1, %2 : vector<32x32xi32>
    %4 = arith.extui %3 : vector<32x32xi1> to vector<32x32xi32>
    %5 = arith.sitofp %4 : vector<32x32xi32> to vector<32x32xf32>
    %cst = arith.constant dense<0.000000e+00> : vector<32x8xf32>
    %6 = tpu.matmul %5, %0, %cst {dimension_numbers = #tpu.dot_dimension_numbers<[1], [1], [0], [0], [0, 0, 1, 0], [], []>} : vector<32x32xf32>, vector<8x32xf32>, vector<32x8xf32> -> vector<32x8xf32>
    %cst_1 = arith.constant dense<0xFF800000> : vector<8xf32>
    %7 = vector.multi_reduction <maximumf>, %6, %cst_1 [0] : vector<32x8xf32> to vector<8xf32>
    %8 = vector.shape_cast %7 : vector<8xf32> to vector<1x8xf32>
    %9 = vector.broadcast %8 : vector<1x8xf32> to vector<32x8xf32>
    %10 = arith.subf %6, %9 : vector<32x8xf32>
    %11 = math.exp %10 : vector<32x8xf32>
    %cst_2 = arith.constant dense<0.000000e+00> : vector<8xf32>
    %12 = vector.multi_reduction <add>, %11, %cst_2 [0] : vector<32x8xf32> to vector<8xf32>
    %13 = vector.shape_cast %12 : vector<8xf32> to vector<1x8xf32>
    %14 = tpu.iota {dimensions = array<i32: 0>} : vector<32x8xi32>
    %c0_3 = arith.constant 0 : index
    %c0_4 = arith.constant 0 : index
    %15 = vector.load %arg2[%c0_3, %c0_4] : memref<1x8xi32, #tpu.memory_space<vmem>>, vector<1x8xi32>
    %16 = vector.broadcast %15 : vector<1x8xi32> to vector<32x8xi32>
    %17 = arith.cmpi eq, %14, %16 : vector<32x8xi32>
    %cst_5 = arith.constant 0.000000e+00 : f32
    %18 = vector.broadcast %cst_5 : f32 to vector<32x8xf32>
    %19 = arith.select %17, %11, %18 : vector<32x8xi1>, vector<32x8xf32>
    %cst_6 = arith.constant dense<0.000000e+00> : vector<8xf32>
    %20 = vector.multi_reduction <add>, %19, %cst_6 [0] : vector<32x8xf32> to vector<8xf32>
    %21 = vector.shape_cast %20 : vector<8xf32> to vector<1x8xf32>
    %22 = tpu.reciprocal %13 : vector<1x8xf32> -> vector<1x8xf32>
    %23 = arith.mulf %21, %22 : vector<1x8xf32>
    %cst_7 = arith.constant 0.000000e+00 : f32
    %24 = vector.broadcast %cst_7 : f32 to vector<1x8xf32>
    %25 = arith.subf %24, %23 : vector<1x8xf32>
    %c0_8 = arith.constant 0 : index
    %c0_9 = arith.constant 0 : index
    %26 = vector.load %arg3[%c0_8, %c0_9] : memref<1x8xf32, #tpu.memory_space<vmem>>, vector<1x8xf32>
    tpu.vector_store %arg3[%c0_8, %c0_9], %25 {strides = array<i32>} : memref<1x8xf32, #tpu.memory_space<vmem>>, vector<1x8xf32>,
    return
  }
  func.func @transform_0(%arg0: i32) -> (i32, i32) {
    %c0_i32 = arith.constant 0 : i32
    %c0_i32_0 = arith.constant 0 : i32
    return %arg0, %c0_i32 : i32, i32
  }
  func.func @transform_1(%arg0: i32) -> (i32, i32) {
    %c0_i32 = arith.constant 0 : i32
    %c0_i32_0 = arith.constant 0 : i32
    return %c0_i32, %arg0 : i32, i32
  }
  func.func @transform_2(%arg0: i32) -> (i32, i32) {
    %c0_i32 = arith.constant 0 : i32
    %c0_i32_0 = arith.constant 0 : i32
    return %c0_i32, %arg0 : i32, i32
  }
}

</mosaic_0001>

<bundles_post_ra>
// kernel: tpu_custom_call.1
= control target key start
LH: loop header
LB: loop body
LE: loop exit
PB: predicated region body
PF: predicated region fallthrough
CT: control target
= control target key end

     0   :  { %7 = vsyncpa [#allocation3], 0  ;;  %s374_s0 = inlined_call_operand.hbm [shape: f32[8,32], index: 0, kind: input, shape index: {}]   ;;  %s375_s1 = inlined_call_operand.vmem [shape: s32[1,8], index: 1, kind: input, shape index: {}]   ;;  %s376_s2 = inlined_call_operand.hbm [shape: f32[1,8], index: 2, kind: output, shape index: {}]  }
   0x1   :  { %8 = vsyncpa [#allocation4], 0  ;;  %s312_s9 = smov [#allocation2]  }
   0x2   :  { %s15_s10 = sshll.u32 %s312_s9, 4  ;;  %s16_s10 = int_to_ptr.vmem [resolvable:$true] %s15_s10 }
   0x3   :  { %s276_s11 = scalar_lea.vmem %s16_s10, 128  ;;  %p281_p1 = scmp.lt.s32.totalorder %s16_s10, %s16_s10 }
   0x4   :  { %p277_p0 = scmp.ne.s32.totalorder %s16_s10, %s276_s11  ;;  %p282_p2 = scmp.lt.s32.totalorder %s276_s11, %s276_s11 }
   0x6   :  { %p283_p3 = por %p282_p2, %p281_p1 }
   0x8   :  { %p284_p4 = pnand %p283_p3, %p277_p0 }
   0xa   :  { %287 = shalt.err (!%p284_p4)
}
   0xb   :  { %18 = dma.hbm_to_vmem [thread:$0]  %s374_s0, 128, %s16_s10, [#allocation3]  }
   0xc   :  { %308 = dma.done.wait [#allocation3], 128  }
   0xd   :  { %309 = vsyncadd [#allocation3], 4294967168  ;;  %v25_v0 = vlaneseq  ;;  %vm44_vm1 = vcmask 261120   ;;  %v313_v6 = vmov 0.0   ;;  %v24_v8 = vld [vmem:[#allocation2] sm:$0xff]  ;;  %vm145_vm5 = vcmask 64512  }
   0xe   :  { %245 = vmatprep.subr.msk.mxu0 %vm44_vm1, %v24_v8  ;;  %253 = vmatprep.subr.msk.mxu1 %vm44_vm1, %v24_v8  ;;  %v239_v37 = vld [vmem:[%s375_s1] ss:$0 sm:$0xff]  ;;  %s314_s1 = smov [#allocation5]   ;;  %vm213_vm10 = vcmask 57344  }
   0xf   :  { %v333_v1 = vshrl.u32 %v25_v0, 7  ;;  %v31_v2 = vand.u32 127, %v25_v0  ;;  %246 = vmatpush3.xpose.msk.msra.mxu0 %vm44_vm1, %v24_v8  ;;  %254 = vmatpush3.xpose.msk.msra.mxu1 %vm44_vm1, %v24_v8  ;;  %s221_s15 = sshll.u32 %s314_s1, 4  ;;  %s222_s15 = int_to_ptr.vmem [resolvable:$true] %s221_s15 }
  0x10   :  { %s288_s16 = scalar_lea.vmem %s222_s15, 16  ;;  %s292_s17 = scalar_lea.vmem %s222_s15, 32 }
  0x11   :  { %vm32_vm0 = vcmp.eq.s32.totalorder %v333_v1, %v31_v2  ;;  %v337_v3 = vadd.s32 16, %v333_v1  ;;  %v27_v4 = vadd.s32 8, %v333_v1  ;;  %v341_v5 = vadd.s32 24, %v333_v1  ;;  %p289_p5 = scmp.ne.s32.totalorder %s222_s15, %s288_s16  ;;  %p293_p6 = scmp.lt.s32.totalorder %s222_s15, %s222_s15 }
  0x12   :  { %v230_v7 = vsel %vm32_vm0, 1.0, %v313_v6  ;;  %vm189_vm6 = vcmp.eq.s32.totalorder %v333_v1, %v239_v37  ;;  %p294_p7 = scmp.lt.s32.totalorder %s292_s17, %s288_s16 }
  0x13   :  { %247 = vmatprep.mubr.msk.f32.mxu0 %vm44_vm1, %v230_v7  ;;  %vm34_vm2 = vcmp.eq.s32.totalorder %v337_v3, %v31_v2  ;;  %vm33_vm3 = vcmp.eq.s32.totalorder %v27_v4, %v31_v2  ;;  %vm35_vm4 = vcmp.eq.s32.totalorder %v341_v5, %v31_v2  ;;  %vm190_vm7 = vcmp.eq.s32.totalorder %v27_v4, %v239_v37 }
  0x14   :  { %v232_v9 = vsel %vm34_vm2, 1.0, %v313_v6  ;;  %v231_v10 = vsel %vm33_vm3, 1.0, %v313_v6  ;;  %v233_v11 = vsel %vm35_vm4, 1.0, %v313_v6  ;;  %vm191_vm8 = vcmp.eq.s32.totalorder %v337_v3, %v239_v37  ;;  %p295_p8 = por %p294_p7, %p293_p6 }
  0x15   :  { %250 = vmatprep.mubr.msk.f32.mxu1 %vm44_vm1, %v232_v9  ;;  %248 = vmatmul.mubr.msk.f32.vlgmr.msra.gmra.mxu0 %vm44_vm1, %v231_v10  ;;  %vm192_vm9 = vcmp.eq.s32.totalorder %v341_v5, %v239_v37 }
  0x16   :  { %251 = vmatmul.mubr.msk.f32.vlgmr.msra.gmra.mxu1 %vm44_vm1, %v233_v11  ;;  %p296_p9 = pnand %p295_p8, %p289_p5 }
  0xd5   :  { %v249_v12 = vpop.f32.mrf.mxu0 }
  0xd6   :  { %v252_v13 = vpop.f32.mrf.mxu1  ;;  %v147_v16 = vsel %vm145_vm5, %v249_v12, -inf }
  0xd7   :  { %v126_v14 = vpop.f32.mrf.mxu0  ;;  %v149_v17 = vsel %vm145_vm5, %v252_v13, -inf }
  0xd8   :  { %v136_v15 = vpop.f32.mrf.mxu1  ;;  %v146_v18 = vsel %vm145_vm5, %v126_v14, -inf }
  0xd9   :  { %v148_v19 = vsel %vm145_vm5, %v136_v15, -inf  ;;  %v150_v20 = vmax.f32 %v146_v18, %v147_v16 }
  0xda   :  { %v151_v21 = vmax.f32 %v148_v19, %v149_v17 }
  0xdc   :  { %v152_v22 = vmax.f32 %v150_v20, %v151_v21 }
  0xde   :  { %v153_v23 = vrot.slane %v152_v22, 4 }
  0xe0   :  { %v154_v24 = vmax.f32 %v152_v22, %v153_v23 }
  0xe2   :  { %v155_v25 = vrot.slane %v154_v24, 2 }
  0xe4   :  { %v156_v26 = vmax.f32 %v154_v24, %v155_v25 }
  0xe6   :  { %v157_v27 = vrot.slane %v156_v26, 1 }
  0xe8   :  { %v158_v28 = vmax.f32 %v156_v26, %v157_v27 }
  0xea   :  { %v159_v29 = vsub.f32 %v126_v14, %v158_v28  ;;  %v160_v30 = vsub.f32 %v249_v12, %v158_v28  ;;  %v161_v31 = vsub.f32 %v136_v15, %v158_v28  ;;  %v162_v32 = vsub.f32 %v252_v13, %v158_v28 }
  0xec   :  { %v163_v33 = vmul.f32 1.442695, %v159_v29  ;;  %v165_v34 = vmul.f32 1.442695, %v160_v30  ;;  %v167_v35 = vmul.f32 1.442695, %v161_v31 }
  0xed   :  { %v169_v36 = vmul.f32 1.442695, %v162_v32 }
  0xee   :  { %258 = vpow2.f32 %v163_v33 }
  0xef   :  { %260 = vpow2.f32 %v165_v34 }
  0xf0   :  { %262 = vpow2.f32 %v167_v35 }
  0xf1   :  { %264 = vpow2.f32 %v169_v36 }
  0xfb   :  { %v259_v38 = vpop.eup %258 }
  0xfc   :  { %v261_v39 = vpop.eup %260  ;;  %v171_v40 = vsel %vm145_vm5, %v259_v38, 0.0  ;;  %v193_v41 = vsel %vm189_vm6, %v259_v38, 0.0 }
  0xfd   :  { %v263_v42 = vpop.eup %262  ;;  %v172_v43 = vsel %vm145_vm5, %v261_v39, 0.0  ;;  %v194_v44 = vsel %vm190_vm7, %v261_v39, 0.0  ;;  %v197_v45 = vsel %vm145_vm5, %v193_v41, 0.0 }
  0xfe   :  { %v265_v46 = vpop.eup %264  ;;  %v173_v47 = vadd.f32 %v172_v43, %v171_v40  ;;  %v195_v48 = vsel %vm191_vm8, %v263_v42, 0.0  ;;  %v198_v49 = vsel %vm145_vm5, %v194_v44, 0.0  ;;  %v174_v50 = vsel %vm145_vm5, %v263_v42, 0.0 }
  0xff   :  { %v196_v51 = vsel %vm192_vm9, %v265_v46, 0.0  ;;  %v199_v52 = vadd.f32 %v198_v49, %v197_v45  ;;  %v200_v54 = vsel %vm145_vm5, %v195_v48, 0.0  ;;  %v176_v55 = vsel %vm145_vm5, %v265_v46, 0.0 }
 0x100   :  { %v175_v53 = vadd.f32 %v174_v50, %v173_v47  ;;  %v202_v58 = vsel %vm145_vm5, %v196_v51, 0.0 }
 0x101   :  { %v201_v56 = vadd.f32 %v200_v54, %v199_v52 }
 0x102   :  { %v177_v57 = vadd.f32 %v176_v55, %v175_v53 }
 0x103   :  { %v203_v59 = vadd.f32 %v202_v58, %v201_v56 }
 0x104   :  { %v178_v60 = vrot.slane %v177_v57, 4 }
 0x105   :  { %v204_v63 = vrot.slane %v203_v59, 4 }
 0x106   :  { %v179_v61 = vadd.f32 %v178_v60, %v177_v57 }
 0x107   :  { %v205_v2 = vadd.f32 %v204_v63, %v203_v59 }
 0x108   :  { %v180_v62 = vrot.slane %v179_v61, 2 }
 0x109   :  { %v206_v4 = vrot.slane %v205_v2, 2 }
 0x10a   :  { %v181_v0 = vadd.f32 %v180_v62, %v179_v61 }
 0x10b   :  { %v207_v5 = vadd.f32 %v206_v4, %v205_v2 }
 0x10c   :  { %v182_v1 = vrot.slane %v181_v0, 1 }
 0x10d   :  { %v208_v6 = vrot.slane %v207_v5, 1 }
 0x10e   :  { %v183_v3 = vadd.f32 %v182_v1, %v181_v0 }
 0x10f   :  { %v209_v7 = vadd.f32 %v208_v6, %v207_v5 }
 0x110   :  { %266 = vrcp.f32 %v183_v3 }
 0x11d   :  { %v267_v8 = vpop.eup %266 }
 0x11e   :  { %v211_v9 = vmul.f32 %v267_v8, %v209_v7 }
 0x120   :  { %v212_v10 = vsub.f32 0.0, %v211_v9 }
 0x122   :  { %214 = vst.msk [vmem:[#allocation5] sm:$0x1] %vm213_vm10, %v212_v10 }
 0x123   :  { %299 = shalt.err (!%p296_p9)
}
 0x124   :  { %224 = dma.vmem_to_hbm [thread:$0]  %s222_s15, 16, %s376_s2, [#allocation4]  }
 0x125   :  { %310 = dma.done.wait [#allocation4], 16  }
 0x126   :  { %311 = vsyncadd [#allocation4], 4294967280 }
 0x127   :  { %228 = vsyncpa [#allocation3], 1 }
 0x128   :  { %229 = vsyncpa [#allocation4], 1 }

</bundles_post_ra>
